<compile_context>
chip_gen: v6e
topology: v6e:2x2x1
jax: 0.10.0
libtpu: 0.0.40
codegen_flags: <defaults>
</compile_context>

<pallas_src>
import jax
import jax.numpy as jnp
from jax.experimental import pallas as pl
from jax.experimental.pallas import tpu as pltpu


# ---------------------------------------------------------------------------
# Stage A: set MLP + fused first suffix conv, on flattened (B*N, F) rows.
# ---------------------------------------------------------------------------
def _set_mlp_kernel(x_ref, w0_ref, b0_ref, w1_ref, b1_ref, wcat_ref, bcat_ref, a_ref):
    t = jnp.dot(x_ref[...], w0_ref[...], preferred_element_type=jnp.float32) + b0_ref[...]
    t = jnp.maximum(t, 0.0)                                            # (TR, d0)
    u = jnp.dot(t, w1_ref[...], preferred_element_type=jnp.float32) + b1_ref[...]
    u = jnp.maximum(u, 0.0)                                            # (TR, D)
    # fused halves of the first suffix conv: [:, :H] = u @ Wj, [:, H:] = u @ Wi + b
    a_ref[...] = (jnp.dot(u, wcat_ref[...], preferred_element_type=jnp.float32)
                  + bcat_ref[...]).astype(a_ref.dtype)


# ---------------------------------------------------------------------------
# Stage B: pairwise ReLU features + final 1x1 conv (H -> 1).
#   aj_ref: (TB, H, N)   column (j) features, transposed -> N stays in lanes
#   ai_ref: (TB, TI, H)  row (i) features (first-layer bias already folded in)
#   w1_ref: (H,)  SMEM   final-layer weights (scalar FMA multipliers)
#   b1_ref: (1,)  SMEM   final-layer bias
# ---------------------------------------------------------------------------
def _pairwise_suffix_kernel(aj_ref, ai_ref, w1_ref, b1_ref, o_ref):
    TB, TI, N = o_ref.shape
    H = aj_ref.shape[1]
    acc = jnp.full((TB, TI, N), b1_ref[0], dtype=jnp.float32)
    # Static FMA loop over H: lanes stay = N throughout, the H reduction never goes
    # through a cross-lane sum, and w1[h] is a scalar read from SMEM.
    for h in range(H):
        t = jnp.maximum(ai_ref[:, :, h:h + 1] + aj_ref[:, h:h + 1, :], 0.0)   # (TB, TI, N)
        acc = acc + w1_ref[h] * t.astype(jnp.float32)
    o_ref[...] = acc.astype(o_ref.dtype)


# ---------------------------------------------------------------------------
# Tiling / VMEM helpers.
# ---------------------------------------------------------------------------
def _vmem_ceiling_bytes():
    """~75% of per-core VMEM: ~48 MiB on v7x (64 MiB/TC), ~96 MiB on v5e/v6e."""
    try:
        cap = int(getattr(pltpu.get_tpu_info(), "vmem_capacity_bytes", 0))
        if cap > 0:
            return (cap * 3) // 4
    except Exception:
        pass
    return 48 << 20          # conservative fallback that fits every generation


def _clamp_vmem(nbytes, ceiling):
    return int(min(max(int(nbytes), 16 << 20), ceiling))


def _pick_row_tile(rows, max_rows=2048):
    """Row tile for stage A: full rows if small, else a sublane-aligned divisor."""
    if rows <= max_rows:
        return rows
    for cand in range(max_rows, 0, -1):
        if rows % cand == 0 and cand % 8 == 0:
            return cand
    return rows


def _pick_pair_tiles(B, N, H, esize, budget_bytes):
    """Batch tile TB / row stripe TI for stage B."""
    def est(tb, ti):                                  # per-step VMEM footprint
        return (2 * tb * H * N * esize                # a_j block (double buffered)
                + 2 * tb * ti * H * esize             # a_i block (double buffered)
                + 5 * tb * ti * N * 4)                # out block (x2) + acc + temps
    ti_cands = [c for c in range(N, 0, -1) if N % c == 0 and (c % 8 == 0 or c == N)]
    tb_cands = [c for c in range(B, 0, -1) if B % c == 0]
    tb, ti = 1, ti_cands[-1]
    for cand_ti in ti_cands:                          # prefer the largest row stripe
        fit = next((c for c in tb_cands if est(c, cand_ti) <= budget_bytes), None)
        if fit is not None:
            tb, ti = fit, cand_ti
            break
    # v7x has 2 TensorCores: keep >= 2 steps on the parallel grid so both get work.
    if B // tb == 1 and N // ti == 1 and B > 1:
        tb = next(c for c in tb_cands if c <= B // 2)
    return tb, ti


# ---------------------------------------------------------------------------
# Wrapper.
# ---------------------------------------------------------------------------
def set_to_graph_siam(x, params, *, batch_tile=None, row_stripe=None,
                      pairwise_dtype=jnp.float32):
    """x: (B, N, F) float32 -> (B, 1, N, N) float32 (matches the PyTorch NCHW output).

    pairwise_dtype: dtype of the pipelined a_i / a_j inputs and the pairwise add+ReLU.
      jnp.bfloat16 halves their footprint and ~doubles VPU throughput on v6e / v7x
      (accumulation stays float32); keep float32 on v5e (no bf16 VALU).
    """
    w0, b0, w1, b1, sw0, sb0, sw1, sb1 = params
    B, N, F = x.shape
    D = w1.shape[1]
    H = sw0.shape[1]
    assert sw0.shape[0] == 2 * D

    vmem_ceiling = _vmem_ceiling_bytes()
    f32 = 4

    # ---- Stage A: set MLP + fused suffix halves, over flattened rows --------------
    # [Wj | Wi]: one MXU matmul instead of two; the first suffix bias is folded onto
    # the a_i half only (it must be added exactly once per pair).
    wcat = jnp.concatenate([sw0[:D], sw0[D:]], axis=1)                       # (D, 2H)
    bcat = jnp.concatenate([jnp.zeros((1, H), sw0.dtype), sb0], axis=1)      # (1, 2H)

    rows = B * N
    TR = _pick_row_tile(rows)
    assert rows % TR == 0 and (TR == rows or TR % 8 == 0)
    x_rows = x.reshape(rows, F)

    def const_spec(arr, n_grid_args):
        zeros = (0,) * arr.ndim
        if n_grid_args == 1:
            return pl.BlockSpec(arr.shape, lambda r: zeros)
        return pl.BlockSpec(arr.shape, lambda bt, si: zeros)

    d0, d1 = w0.shape[1], w1.shape[1]
    wbytes = f32 * sum(int(a.size) for a in (w0, b0, w1, b1, wcat, bcat))
    vmem_a = (f32 * (2 * TR * F + 2 * TR * (d0 + d1) + 4 * TR * H)
              + 2 * wbytes + (2 << 20))

    a_cat = pl.pallas_call(
        _set_mlp_kernel,
        out_shape=jax.ShapeDtypeStruct((rows, 2 * H), jnp.float32),
        grid_spec=pltpu.PrefetchScalarGridSpec(
            num_scalar_prefetch=0,
            grid=(rows // TR,),
            in_specs=[pl.BlockSpec((TR, F), lambda r: (r, 0)),
                      const_spec(w0, 1), const_spec(b0, 1),
                      const_spec(w1, 1), const_spec(b1, 1),
                      const_spec(wcat, 1), const_spec(bcat, 1)],
            out_specs=pl.BlockSpec((TR, 2 * H), lambda r: (r, 0)),
        ),
        compiler_params=pltpu.CompilerParams(
            dimension_semantics=("parallel",),
            vmem_limit_bytes=_clamp_vmem(vmem_a, vmem_ceiling)),
    )(x_rows, w0, b0, w1, b1, wcat, bcat)

    # ---- split / transpose between the stages (tiny, plain XLA) -------------------
    a_all = a_cat.reshape(B, N, 2 * H)
    a_j_t = jnp.transpose(a_all[:, :, :H], (0, 2, 1)).astype(pairwise_dtype)  # (B, H, N)
    a_i = a_all[:, :, H:].astype(pairwise_dtype)                              # (B, N, H)

    # ---- Stage B: pairwise ReLU + final 1x1 conv -----------------------------------
    esize = jnp.dtype(pairwise_dtype).itemsize
    tb_auto, ti_auto = _pick_pair_tiles(B, N, H, esize, vmem_ceiling // 2)
    TB = batch_tile if batch_tile is not None else tb_auto
    TI = row_stripe if row_stripe is not None else ti_auto
    assert B % TB == 0 and N % TI == 0
    assert TI == N or TI % 8 == 0
    NS = N // TI

    vmem_b = (2 * TB * H * N * esize + 2 * TB * TI * H * esize
              + 5 * TB * TI * N * f32 + (2 << 20))

    out3 = pl.pallas_call(
        _pairwise_suffix_kernel,
        out_shape=jax.ShapeDtypeStruct((B, N, N), jnp.float32),
        grid_spec=pltpu.PrefetchScalarGridSpec(
            num_scalar_prefetch=0,
            grid=(B // TB, NS),
            in_specs=[
                pl.BlockSpec((TB, H, N), lambda bt, si: (bt, 0, 0)),     # a_j: per batch tile
                pl.BlockSpec((TB, TI, H), lambda bt, si: (bt, si, 0)),   # a_i: per row stripe
                pl.BlockSpec(memory_space=pltpu.MemorySpace.SMEM),       # w1 (H,)
                pl.BlockSpec(memory_space=pltpu.MemorySpace.SMEM),       # final bias (1,)
            ],
            out_specs=pl.BlockSpec((TB, TI, N), lambda bt, si: (bt, si, 0)),
        ),
        compiler_params=pltpu.CompilerParams(
            dimension_semantics=("parallel", "parallel"),
            vmem_limit_bytes=_clamp_vmem(vmem_b, vmem_ceiling)),
    )(a_j_t, a_i, sw1.reshape(H), sb1.reshape(1))

    return out3[:, None, :, :]


# ---------------------------------------------------------------------------
# Params / pure-JAX reference (mirrors the PyTorch forward, feature-last).
# ---------------------------------------------------------------------------
def init_params(key, in_features, set_fn_feats, hidden_mlp):
    assert len(set_fn_feats) == 2 and len(hidden_mlp) == 1
    d0, d1 = set_fn_feats
    h = hidden_mlp[0]
    ks = jax.random.split(key, 8)

    def lin(k, fan_in, fan_out):
        scale = 1.0 / jnp.sqrt(jnp.float32(fan_in))
        return jax.random.uniform(k, (fan_in, fan_out), jnp.float32, -scale, scale)

    w0 = lin(ks[0], in_features, d0); b0 = lin(ks[1], 1, d0)
    w1 = lin(ks[2], d0, d1);          b1 = lin(ks[3], 1, d1)
    sw0 = lin(ks[4], 2 * d1, h);      sb0 = lin(ks[5], 1, h)
    sw1 = lin(ks[6], h, 1);           sb1 = lin(ks[7], 1, 1)
    return (w0, b0, w1, b1, sw0, sb0, sw1, sb1)


def reference(x, params):
    w0, b0, w1, b1, sw0, sb0, sw1, sb1 = params
    u = jnp.maximum(x @ w0 + b0, 0.0)
    u = jnp.maximum(u @ w1 + b1, 0.0)                            # (B, N, D)
    B, N, D = u.shape
    m1 = jnp.broadcast_to(u[:, None, :, :], (B, N, N, D))        # [b,i,j] = u[b,j]
    m2 = jnp.broadcast_to(u[:, :, None, :], (B, N, N, D))        # [b,i,j] = u[b,i]
    block = jnp.concatenate([m1, m2], axis=-1)                   # (B, N, N, 2D)
    hdn = jnp.maximum(block @ sw0 + sb0, 0.0)
    out = hdn @ sw1 + sb1                                        # (B, N, N, 1)
    return jnp.transpose(out, (0, 3, 1, 2))                      # (B, 1, N, N)


if __name__ == "__main__":
    key = jax.random.PRNGKey(0)
    kp, kx, kp2, kx2 = jax.random.split(key, 4)

    # Config 1: auto tiling (full row stripe; batch axis split so the parallel grid
    # has >= 2 steps for the dual-TC chips).
    B, N, F = 4, 16, 6
    params = init_params(kp, F, [32, 32], [32])
    x = jax.random.normal(kx, (B, N, F), jnp.float32)
    out = jax.block_until_ready(set_to_graph_siam(x, params))
    ref = reference(x, params)
    assert out.shape == (B, 1, N, N), out.shape
    err = float(jnp.max(jnp.abs(out - ref)))
    assert jnp.allclose(out, ref, atol=2e-3, rtol=2e-3), err

    # Config 2: forced batch tiling + row striping (multi-step grid, pipelined a_i
    # stripes while a_j stays resident for the batch tile).
    B2, N2, F2 = 4, 32, 4
    params2 = init_params(kp2, F2, [16, 16], [16])
    x2 = jax.random.normal(kx2, (B2, N2, F2), jnp.float32)
    out2 = jax.block_until_ready(
        set_to_graph_siam(x2, params2, batch_tile=2, row_stripe=8))
    ref2 = reference(x2, params2)
    assert out2.shape == (B2, 1, N2, N2), out2.shape
    err2 = float(jnp.max(jnp.abs(out2 - ref2)))
    assert jnp.allclose(out2, ref2, atol=2e-3, rtol=2e-3), err2

    print("KERNEL_OK")
</pallas_src>

<mosaic_0001>
module attributes {stable_mosaic.version = 11 : i64} {
  func.func @_set_mlp_kernel(%arg0: i32, %arg1: memref<64x6xf32, #tpu.memory_space<vmem>>, %arg2: memref<6x32xf32, #tpu.memory_space<vmem>>, %arg3: memref<1x32xf32, #tpu.memory_space<vmem>>, %arg4: memref<32x32xf32, #tpu.memory_space<vmem>>, %arg5: memref<1x32xf32, #tpu.memory_space<vmem>>, %arg6: memref<32x64xf32, #tpu.memory_space<vmem>>, %arg7: memref<1x64xf32, #tpu.memory_space<vmem>>, %arg8: memref<64x64xf32, #tpu.memory_space<vmem>>) attributes {dimension_semantics = [#tpu.dimension_semantics<parallel>], iteration_bounds = array<i64: 1>, scalar_prefetch = 0 : i64, scratch_operands = 0 : i64, tpu.core_type = #tpu.core_type<tc>, window_params = [{transform_indices = @transform_0, window_bounds = array<i64: 64, 6>}, {pipeline_mode = #tpu.pipeline_mode<synchronous>, transform_indices = @transform_1, window_bounds = array<i64: 6, 32>}, {pipeline_mode = #tpu.pipeline_mode<synchronous>, transform_indices = @transform_2, window_bounds = array<i64: 1, 32>}, {pipeline_mode = #tpu.pipeline_mode<synchronous>, transform_indices = @transform_3, window_bounds = array<i64: 32, 32>}, {pipeline_mode = #tpu.pipeline_mode<synchronous>, transform_indices = @transform_4, window_bounds = array<i64: 1, 32>}, {pipeline_mode = #tpu.pipeline_mode<synchronous>, transform_indices = @transform_5, window_bounds = array<i64: 32, 64>}, {pipeline_mode = #tpu.pipeline_mode<synchronous>, transform_indices = @transform_6, window_bounds = array<i64: 1, 64>}, {transform_indices = @transform_7, window_bounds = array<i64: 64, 64>}]} {
    %c0 = arith.constant 0 : index
    %c0_0 = arith.constant 0 : index
    %0 = vector.load %arg1[%c0, %c0_0] : memref<64x6xf32, #tpu.memory_space<vmem>>, vector<64x6xf32>
    %c0_1 = arith.constant 0 : index
    %c0_2 = arith.constant 0 : index
    %1 = vector.load %arg2[%c0_1, %c0_2] : memref<6x32xf32, #tpu.memory_space<vmem>>, vector<6x32xf32>
    %cst = arith.constant dense<0.000000e+00> : vector<64x32xf32>
    %2 = tpu.matmul %0, %1, %cst {dimension_numbers = #tpu.dot_dimension_numbers<[1], [0], [0], [1], [0, 0, 1, 1], [], []>} : vector<64x6xf32>, vector<6x32xf32>, vector<64x32xf32> -> vector<64x32xf32>
    %c0_3 = arith.constant 0 : index
    %c0_4 = arith.constant 0 : index
    %3 = vector.load %arg3[%c0_3, %c0_4] : memref<1x32xf32, #tpu.memory_space<vmem>>, vector<1x32xf32>
    %4 = vector.broadcast %3 : vector<1x32xf32> to vector<64x32xf32>
    %5 = arith.addf %2, %4 : vector<64x32xf32>
    %cst_5 = arith.constant 0.000000e+00 : f32
    %6 = vector.broadcast %cst_5 : f32 to vector<64x32xf32>
    %7 = arith.maximumf %5, %6 : vector<64x32xf32>
    %c0_6 = arith.constant 0 : index
    %c0_7 = arith.constant 0 : index
    %8 = vector.load %arg4[%c0_6, %c0_7] : memref<32x32xf32, #tpu.memory_space<vmem>>, vector<32x32xf32>
    %cst_8 = arith.constant dense<0.000000e+00> : vector<64x32xf32>
    %9 = tpu.matmul %7, %8, %cst_8 {dimension_numbers = #tpu.dot_dimension_numbers<[1], [0], [0], [1], [0, 0, 1, 1], [], []>} : vector<64x32xf32>, vector<32x32xf32>, vector<64x32xf32> -> vector<64x32xf32>
    %c0_9 = arith.constant 0 : index
    %c0_10 = arith.constant 0 : index
    %10 = vector.load %arg5[%c0_9, %c0_10] : memref<1x32xf32, #tpu.memory_space<vmem>>, vector<1x32xf32>
    %11 = vector.broadcast %10 : vector<1x32xf32> to vector<64x32xf32>
    %12 = arith.addf %9, %11 : vector<64x32xf32>
    %cst_11 = arith.constant 0.000000e+00 : f32
    %13 = vector.broadcast %cst_11 : f32 to vector<64x32xf32>
    %14 = arith.maximumf %12, %13 : vector<64x32xf32>
    %c0_12 = arith.constant 0 : index
    %c0_13 = arith.constant 0 : index
    %15 = vector.load %arg6[%c0_12, %c0_13] : memref<32x64xf32, #tpu.memory_space<vmem>>, vector<32x64xf32>
    %cst_14 = arith.constant dense<0.000000e+00> : vector<64x64xf32>
    %16 = tpu.matmul %14, %15, %cst_14 {dimension_numbers = #tpu.dot_dimension_numbers<[1], [0], [0], [1], [0, 0, 1, 1], [], []>} : vector<64x32xf32>, vector<32x64xf32>, vector<64x64xf32> -> vector<64x64xf32>
    %c0_15 = arith.constant 0 : index
    %c0_16 = arith.constant 0 : index
    %17 = vector.load %arg7[%c0_15, %c0_16] : memref<1x64xf32, #tpu.memory_space<vmem>>, vector<1x64xf32>
    %18 = vector.broadcast %17 : vector<1x64xf32> to vector<64x64xf32>
    %19 = arith.addf %16, %18 : vector<64x64xf32>
    %c0_17 = arith.constant 0 : index
    %c0_18 = arith.constant 0 : index
    %20 = vector.load %arg8[%c0_17, %c0_18] : memref<64x64xf32, #tpu.memory_space<vmem>>, vector<64x64xf32>
    tpu.vector_store %arg8[%c0_17, %c0_18], %19 {strides = array<i32>} : memref<64x64xf32, #tpu.memory_space<vmem>>, vector<64x64xf32>,
    return
  }
  func.func @transform_0(%arg0: i32) -> (i32, i32) {
    %c0_i32 = arith.constant 0 : i32
    %c0_i32_0 = arith.constant 0 : i32
    return %arg0, %c0_i32 : i32, i32
  }
  func.func @transform_1(%arg0: i32) -> (i32, i32) {
    %c0_i32 = arith.constant 0 : i32
    %c0_i32_0 = arith.constant 0 : i32
    %c0_i32_1 = arith.constant 0 : i32
    return %c0_i32, %c0_i32_0 : i32, i32
  }
  func.func @transform_2(%arg0: i32) -> (i32, i32) {
    %c0_i32 = arith.constant 0 : i32
    %c0_i32_0 = arith.constant 0 : i32
    %c0_i32_1 = arith.constant 0 : i32
    return %c0_i32, %c0_i32_0 : i32, i32
  }
  func.func @transform_3(%arg0: i32) -> (i32, i32) {
    %c0_i32 = arith.constant 0 : i32
    %c0_i32_0 = arith.constant 0 : i32
    %c0_i32_1 = arith.constant 0 : i32
    return %c0_i32, %c0_i32_0 : i32, i32
  }
  func.func @transform_4(%arg0: i32) -> (i32, i32) {
    %c0_i32 = arith.constant 0 : i32
    %c0_i32_0 = arith.constant 0 : i32
    %c0_i32_1 = arith.constant 0 : i32
    return %c0_i32, %c0_i32_0 : i32, i32
  }
  func.func @transform_5(%arg0: i32) -> (i32, i32) {
    %c0_i32 = arith.constant 0 : i32
    %c0_i32_0 = arith.constant 0 : i32
    %c0_i32_1 = arith.constant 0 : i32
    return %c0_i32, %c0_i32_0 : i32, i32
  }
  func.func @transform_6(%arg0: i32) -> (i32, i32) {
    %c0_i32 = arith.constant 0 : i32
    %c0_i32_0 = arith.constant 0 : i32
    %c0_i32_1 = arith.constant 0 : i32
    return %c0_i32, %c0_i32_0 : i32, i32
  }
  func.func @transform_7(%arg0: i32) -> (i32, i32) {
    %c0_i32 = arith.constant 0 : i32
    %c0_i32_0 = arith.constant 0 : i32
    return %arg0, %c0_i32 : i32, i32
  }
}

</mosaic_0001>

<bundles_post_ra>
// kernel: tpu_custom_call.1
= control target key start
LH: loop header
LB: loop body
LE: loop exit
PB: predicated region body
PF: predicated region fallthrough
CT: control target
= control target key end

     0   :  { %vm68_vm0 = vcmask 1045504   ;;  %vm43_vm1 = vcmask 48128   ;;  %s779_s0 = inlined_call_operand.vmem [shape: f32[64,6], index: 0, kind: input, shape index: {}]   ;;  %s780_s1 = inlined_call_operand.vmem [shape: f32[6,32], index: 1, kind: input, shape index: {}]   ;;  %s781_s2 = inlined_call_operand.vmem [shape: f32[1,32], index: 2, kind: input, shape index: {}]   ;;  %s782_s3 = inlined_call_operand.vmem [shape: f32[32,32], index: 3, kind: input, shape index: {}]   ;;  %s783_s4 = inlined_call_operand.vmem [shape: f32[1,32], index: 4, kind: input, shape index: {}]   ;;  %s784_s5 = inlined_call_operand.vmem [shape: f32[32,64], index: 5, kind: input, shape index: {}]   ;;  %s785_s6 = inlined_call_operand.vmem [shape: f32[1,64], index: 6, kind: input, shape index: {}]   ;;  %s786_s7 = inlined_call_operand.hbm [shape: f32[64,64], index: 7, kind: output, shape index: {}]  }
   0x1   :  { %v35_v0 = vld [vmem:[%s780_s1] sm:$0x3f]  ;;  %v28_v2 = vld [vmem:[%s779_s0 + $0x8] sm:$0xff]  ;;  %v29_v3 = vld [vmem:[%s779_s0 + $0x10] sm:$0xff] }
   0x2   :  { %v27_v1 = vld [vmem:[%s779_s0] sm:$0xff]  ;;  %560 = vmatprep.subr.msk.mxu0 %vm68_vm0, %v35_v0  ;;  %614 = vmatprep.subr.msk.mxu1 %vm68_vm0, %v35_v0  ;;  %v32_v5 = vld [vmem:[%s779_s0 + $0x28] sm:$0xff]  ;;  %v33_v6 = vld [vmem:[%s779_s0 + $0x30] sm:$0xff] }
   0x3   :  { %562 = vmatprep.mubr.msk.f32.mxu0 %vm43_vm1, %v27_v1  ;;  %v31_v4 = vld [vmem:[%s779_s0 + $0x20] sm:$0xff]  ;;  %561 = vmatpush3.msk.msra.mxu0 %vm68_vm0, %v35_v0  ;;  %v188_v7 = vld [vmem:[%s782_s3 + $0x18] sm:$0xff] }
   0x4   :  { %563 = vmatmul.mubr.msk.f32.vlgmr.msra.gmra.mxu0 %vm43_vm1, %v28_v2  ;;  %615 = vmatpush3.msk.msra.mxu1 %vm68_vm0, %v35_v0 }
   0x5   :  { %12 = vsyncpa [#allocation3], 0  ;;  %565 = vmatprep.mubr.msk.f32.mxu0 %vm43_vm1, %v29_v3  ;;  %v30_v8 = vld [vmem:[%s779_s0 + $0x18] sm:$0xff]  ;;  %568 = vmatprep.mubr.msk.f32.mxu1 %vm43_vm1, %v31_v4  ;;  %v187_v10 = vld [vmem:[%s782_s3 + $0x10] sm:$0xff]  ;;  %vm196_vm2 = vcmask 261120   ;;  %vm474_vm3 = vcmask 523264  }
   0x6   :  { %569 = vmatmul.mubr.msk.f32.vlgmr.msra.gmra.mxu1 %vm43_vm1, %v32_v5  ;;  %574 = vmatprep.subr.mxu1 %v188_v7  ;;  %v34_v9 = vld [vmem:[%s779_s0 + $0x38] sm:$0xff]  ;;  %v186_v11 = vld [vmem:[%s782_s3 + $0x8] sm:$0xff]  ;;  %v185_v12 = vld [vmem:[%s782_s3] sm:$0xff] }
   0x7   :  { %571 = vmatprep.mubr.msk.f32.mxu1 %vm43_vm1, %v33_v6  ;;  %575 = vmatpush3.msra.mxu1 %v188_v7  ;;  %v337_v13 = vld [vmem:[%s784_s5 + $0x18] sm:$0xff]  ;;  %v499_v14 = vld [vmem:[%s781_s2] ss:$0 sm:$0xff]  ;;  %v336_v39 = vld [vmem:[%s784_s5 + $0x10] sm:$0xff] }
   0x8   :  { %566 = vmatmul.mubr.msk.f32.gmra.mxu0 %vm43_vm1, %v30_v8  ;;  %576 = vmatprep.subr.mxu1 %v187_v10  ;;  %v335_v40 = vld [vmem:[%s784_s5 + $0x8] sm:$0xff]  ;;  %v334_v41 = vld [vmem:[%s784_s5] sm:$0xff] }
   0x9   :  { %577 = vmatpush3.msra.mxu1 %v187_v10  ;;  %594 = vmatprep.subr.mxu0 %v337_v13  ;;  %v509_v42 = vld [vmem:[%s783_s4] ss:$0 sm:$0xff] }
   0xa   :  { %572 = vmatmul.mubr.msk.f32.gmra.mxu1 %vm43_vm1, %v34_v9  ;;  %578 = vmatprep.subr.mxu1 %v186_v11  ;;  %v518_v3 = vld [vmem:[%s785_s6] ss:$0 sm:$0xff]  ;;  %s641_s6 = smov [#allocation2]  }
   0xb   :  { %579 = vmatpush3.msra.mxu1 %v186_v11  ;;  %595 = vmatpush3.msra.mxu0 %v337_v13  ;;  %s488_s11 = sshll.u32 %s641_s6, 4  ;;  %s489_s11 = int_to_ptr.vmem [resolvable:$true] %s488_s11 }
   0xc   :  { %580 = vmatprep.subr.mxu1 %v185_v12  ;;  %596 = vmatprep.subr.mxu0 %v336_v39  ;;  %s619_s12 = scalar_lea.vmem %s489_s11, 1024  ;;  %p624_p1 = scmp.lt.s32.totalorder %s489_s11, %s489_s11 }
   0xd   :  { %581 = vmatpush3.msra.mxu1 %v185_v12  ;;  %597 = vmatpush3.msra.mxu0 %v336_v39  ;;  %p620_p0 = scmp.ne.s32.totalorder %s489_s11, %s619_s12  ;;  %p625_p2 = scmp.lt.s32.totalorder %s619_s12, %s619_s12 }
   0xe   :  { %598 = vmatprep.subr.mxu0 %v335_v40 }
   0xf   :  { %599 = vmatpush3.msra.mxu0 %v335_v40  ;;  %p626_p3 = por %p625_p2, %p624_p1 }
  0x10   :  { %600 = vmatprep.subr.mxu0 %v334_v41 }
  0x11   :  { %601 = vmatpush3.msra.mxu0 %v334_v41  ;;  %p627_p4 = pnand %p626_p3, %p620_p0 }
  0xc4   :  { %v564_v15 = vpop.f32.mrf.mxu0 }
  0xc5   :  { %v144_v16 = vadd.f32 %v564_v15, %v499_v14 }
  0xc6   :  { %v138_v17 = vpop.f32.mrf.mxu0  ;;  %v570_v18 = vpop.f32.mrf.mxu1 }
  0xc7   :  { %v139_v19 = vadd.f32 %v499_v14, %v138_v17  ;;  %v178_v24 = vmax.f32 %v144_v16, 0.0  ;;  %v164_v34 = vadd.f32 %v570_v18, %v499_v14 }
  0xc8   :  { %v567_v20 = vpop.f32.mrf.mxu0  ;;  %v158_v21 = vpop.f32.mrf.mxu1 }
  0xc9   :  { %v177_v22 = vmax.f32 %v139_v19, 0.0  ;;  %v159_v23 = vadd.f32 %v499_v14, %v158_v21  ;;  %v154_v25 = vadd.f32 %v567_v20, %v499_v14  ;;  %v182_v36 = vmax.f32 %v164_v34, 0.0 }
  0xca   :  { %v148_v26 = vpop.f32.mrf.mxu0  ;;  %v573_v27 = vpop.f32.mrf.mxu1 }
  0xcb   :  { %v149_v28 = vadd.f32 %v499_v14, %v148_v26  ;;  %582 = vmatprep.mubr.msk.f32.mxu1 %vm196_vm2, %v177_v22  ;;  %v181_v31 = vmax.f32 %v159_v23, 0.0  ;;  %v180_v33 = vmax.f32 %v154_v25, 0.0  ;;  %v174_v37 = vadd.f32 %v573_v27, %v499_v14 }
  0xcc   :  { %583 = vmatmul.mubr.msk.f32.vlgmr.msra.gmra.mxu1 %vm196_vm2, %v178_v24  ;;  %v168_v29 = vpop.f32.mrf.mxu1 }
  0xcd   :  { %v179_v30 = vmax.f32 %v149_v28, 0.0  ;;  %v169_v32 = vadd.f32 %v499_v14, %v168_v29  ;;  %v184_v38 = vmax.f32 %v174_v37, 0.0 }
  0xcf   :  { %585 = vmatprep.mubr.msk.f32.mxu1 %vm196_vm2, %v179_v30  ;;  %v183_v35 = vmax.f32 %v169_v32, 0.0 }
  0xd0   :  { %586 = vmatmul.mubr.msk.f32.gmra.mxu1 %vm196_vm2, %v180_v33 }
  0xd1   :  { %588 = vmatprep.mubr.msk.f32.mxu1 %vm196_vm2, %v181_v31 }
  0xd4   :  { %589 = vmatmul.mubr.msk.f32.gmra.mxu1 %vm196_vm2, %v182_v36 }
  0xd5   :  { %591 = vmatprep.mubr.msk.f32.mxu1 %vm196_vm2, %v183_v35 }
  0xd8   :  { %592 = vmatmul.mubr.msk.f32.gmra.mxu1 %vm196_vm2, %v184_v38 }
 0x18c   :  { %v584_v43 = vpop.f32.mrf.mxu1 }
 0x18d   :  { %v293_v44 = vadd.f32 %v584_v43, %v509_v42 }
 0x18e   :  { %v287_v45 = vpop.f32.mrf.mxu1 }
 0x18f   :  { %v288_v46 = vadd.f32 %v509_v42, %v287_v45  ;;  %v327_v49 = vmax.f32 %v293_v44, 0.0 }
 0x190   :  { %v587_v47 = vpop.f32.mrf.mxu1 }
 0x191   :  { %v326_v48 = vmax.f32 %v288_v46, 0.0  ;;  %v303_v50 = vadd.f32 %v587_v47, %v509_v42 }
 0x192   :  { %v297_v51 = vpop.f32.mrf.mxu1 }
 0x193   :  { %v298_v52 = vadd.f32 %v509_v42, %v297_v51  ;;  %602 = vmatprep.mubr.msk.f32.mxu0 %vm196_vm2, %v326_v48  ;;  %v329_v55 = vmax.f32 %v303_v50, 0.0 }
 0x194   :  { %v590_v53 = vpop.f32.mrf.mxu1  ;;  %603 = vmatmul.mubr.msk.f32.vlgmr.msra.gmra.mxu0 %vm196_vm2, %v327_v49 }
 0x195   :  { %v328_v54 = vmax.f32 %v298_v52, 0.0  ;;  %v313_v56 = vadd.f32 %v590_v53, %v509_v42 }
 0x196   :  { %v307_v57 = vpop.f32.mrf.mxu1 }
 0x197   :  { %v308_v58 = vadd.f32 %v509_v42, %v307_v57  ;;  %605 = vmatprep.mubr.msk.f32.mxu0 %vm196_vm2, %v328_v54  ;;  %v331_v61 = vmax.f32 %v313_v56, 0.0 }
 0x198   :  { %v593_v59 = vpop.f32.mrf.mxu1  ;;  %606 = vmatmul.mubr.msk.f32.gmra.mxu0 %vm196_vm2, %v329_v55 }
 0x199   :  { %v330_v60 = vmax.f32 %v308_v58, 0.0  ;;  %v323_v62 = vadd.f32 %v593_v59, %v509_v42 }
 0x19a   :  { %v317_v63 = vpop.f32.mrf.mxu1 }
 0x19b   :  { %v318_v0 = vadd.f32 %v509_v42, %v317_v63  ;;  %608 = vmatprep.mubr.msk.f32.mxu0 %vm196_vm2, %v330_v60  ;;  %v333_v2 = vmax.f32 %v323_v62, 0.0 }
 0x19c   :  { %609 = vmatmul.mubr.msk.f32.gmra.mxu0 %vm196_vm2, %v331_v61 }
 0x19d   :  { %v332_v1 = vmax.f32 %v318_v0, 0.0 }
 0x19f   :  { %611 = vmatprep.mubr.msk.f32.mxu0 %vm196_vm2, %v332_v1 }
 0x1a0   :  { %612 = vmatmul.mubr.msk.f32.gmra.mxu0 %vm196_vm2, %v333_v2 }
 0x254   :  { %v604_v4 = vpop.f32.mrf.mxu0 }
 0x255   :  { %v441_v5 = vadd.f32 %v604_v4, %v518_v3 }
 0x256   :  { %v435_v6 = vpop.f32.mrf.mxu0 }
 0x257   :  { %476 = vst.msk [vmem:[#allocation2 + $0x8] sm:$0xff] %vm474_vm3, %v441_v5  ;;  %v436_v7 = vadd.f32 %v518_v3, %v435_v6 }
 0x258   :  { %v607_v8 = vpop.f32.mrf.mxu0 }
 0x259   :  { %475 = vst.msk [vmem:[#allocation2] sm:$0xff] %vm474_vm3, %v436_v7  ;;  %v451_v9 = vadd.f32 %v607_v8, %v518_v3 }
 0x25a   :  { %v445_v10 = vpop.f32.mrf.mxu0 }
 0x25b   :  { %478 = vst.msk [vmem:[#allocation2 + $0x18] sm:$0xff] %vm474_vm3, %v451_v9  ;;  %v446_v11 = vadd.f32 %v518_v3, %v445_v10 }
 0x25c   :  { %v610_v12 = vpop.f32.mrf.mxu0 }
 0x25d   :  { %477 = vst.msk [vmem:[#allocation2 + $0x10] sm:$0xff] %vm474_vm3, %v446_v11  ;;  %v461_v13 = vadd.f32 %v610_v12, %v518_v3 }
 0x25e   :  { %v455_v14 = vpop.f32.mrf.mxu0 }
 0x25f   :  { %480 = vst.msk [vmem:[#allocation2 + $0x28] sm:$0xff] %vm474_vm3, %v461_v13  ;;  %v456_v15 = vadd.f32 %v518_v3, %v455_v14 }
 0x260   :  { %v613_v16 = vpop.f32.mrf.mxu0 }
 0x261   :  { %479 = vst.msk [vmem:[#allocation2 + $0x20] sm:$0xff] %vm474_vm3, %v456_v15  ;;  %v471_v17 = vadd.f32 %v613_v16, %v518_v3 }
 0x262   :  { %v465_v18 = vpop.f32.mrf.mxu0 }
 0x263   :  { %482 = vst.msk [vmem:[#allocation2 + $0x38] sm:$0xff] %vm474_vm3, %v471_v17  ;;  %v466_v19 = vadd.f32 %v518_v3, %v465_v18 }
 0x265   :  { %481 = vst.msk [vmem:[#allocation2 + $0x30] sm:$0xff] %vm474_vm3, %v466_v19 }
 0x266   :  { %630 = shalt.err (!%p627_p4)
}
 0x267   :  { %s642_s13 = smov 128   ;;  %s643_s14 = smov 8  }
 0x268   :  { %494 = dma.vmem_to_hbm [thread:$0]  %s489_s11, 1024, %s786_s7, [#allocation3], %s642_s13, %s642_s13, %s643_s14  }
 0x269   :  { %639 = dma.done.wait [#allocation3], 1024  }
 0x26a   :  { %640 = vsyncadd [#allocation3], 4294966272 }
 0x26b   :  { %498 = vsyncpa [#allocation3], 1 }

</bundles_post_ra>
